<compile_context>
chip_gen: v7x
topology: tpu7x:2x2x1
jax: 0.10.0
libtpu: 0.0.40
codegen_flags: <defaults>
</compile_context>

<pallas_src>
import jax
import jax.numpy as jnp
from jax.experimental import pallas as pl
from jax.experimental.pallas import tpu as pltpu


def _conv_matmul_kernel(p_ref, w_ref, b_ref, o_ref):
    """One (image, pixel-tile) step of the folded conv-as-matmul.

    p_ref : (1, K, TM)        bf16  transposed im2col patches (K = KH*KW*Cin)
    w_ref : (Cout_sub, K)     bf16  folded weight, (kh, kw, cin) contraction order
    b_ref : (Cout_sub, 1)     f32   bias (zero padded)
    o_ref : (1, Cout_sub, TM) f32   transposed output tile (channels on sublanes)
    """
    acc = jnp.dot(w_ref[...], p_ref[0], preferred_element_type=jnp.float32)
    o_ref[0] = (acc + b_ref[...]).astype(o_ref.dtype)


def conv_layer_forward(x_nchw, weight_oihw, bias):
    """Equivalent of convLayer.forward: stride-1, valid-padding Conv2d + bias.

    x_nchw      : (N, Cin, H, W)   float32
    weight_oihw : (Cout, Cin, KH, KW)
    bias        : (Cout,)
    returns     : (N, Cout, Ho, Wo) float32
    """
    N, Cin, H, W = x_nchw.shape
    Cout, _, KH, KW = weight_oihw.shape
    Ho, Wo = H - KH + 1, W - KW + 1
    K = KH * KW * Cin
    M = Ho * Wo

    # Output channels only need sublane (8) rounding in this layout; the MXU's
    # wide (lane) dimension is the pixel axis, padded to a multiple of 128.
    Cout_sub = ((Cout + 7) // 8) * 8
    M128 = ((M + 127) // 128) * 128
    tile_m = min(512, M128)                      # lane-dense pixel tile
    M_pad = ((M + tile_m - 1) // tile_m) * tile_m
    num_m = M_pad // tile_m

    # --- wrapper-side im2col / layout glue (plain JAX, fused by XLA) --------
    xb = x_nchw.astype(jnp.bfloat16)
    # Transposed patches, contraction index ordered (kh, kw, cin):
    #   patches[n, (kh*KW+kw)*Cin + c, i, j] = x[n, c, i+kh, j+kw]
    patches = jnp.concatenate(
        [xb[:, :, kh:kh + Ho, kw:kw + Wo]
         for kh in range(KH) for kw in range(KW)], axis=1)       # (N, K, Ho, Wo)
    patches = patches.reshape(N, K, M)
    patches = jnp.pad(patches, ((0, 0), (0, 0), (0, M_pad - M)))  # (N, K, M_pad)

    # Weight folded to match the (kh, kw, cin) ordering:  (Cout_sub, K)
    w_t = jnp.transpose(weight_oihw, (0, 2, 3, 1)).reshape(Cout, K)
    w_t = jnp.pad(w_t, ((0, Cout_sub - Cout), (0, 0))).astype(jnp.bfloat16)
    b_p = jnp.pad(bias, (0, Cout_sub - Cout)).reshape(Cout_sub, 1)
    b_p = b_p.astype(jnp.float32)

    # --- VMEM budget: 2x pipelined blocks + 1x resident weight/bias ---------
    in_blk = K * tile_m * 2                       # bf16 patches block
    out_blk = Cout_sub * tile_m * 4               # f32 output block
    resident = Cout_sub * K * 2 + Cout_sub * 4    # weight + bias (constant maps)
    need = 2 * (in_blk + out_blk) + resident + (2 << 20)
    try:
        phys = int(pltpu.get_tpu_info().vmem_capacity_bytes)
    except Exception:
        phys = 64 * 1024 * 1024                   # conservative (v7x per-TC)
    vmem_limit = min(int(phys * 0.75), max(need, 16 * 1024 * 1024))

    out = pl.pallas_call(
        _conv_matmul_kernel,
        out_shape=jax.ShapeDtypeStruct((N, Cout_sub, M_pad), jnp.float32),
        grid_spec=pltpu.PrefetchScalarGridSpec(
            num_scalar_prefetch=0,
            grid=(N, num_m),
            in_specs=[
                pl.BlockSpec((1, K, tile_m), lambda n, m: (n, 0, m)),
                pl.BlockSpec((Cout_sub, K), lambda n, m: (0, 0)),
                pl.BlockSpec((Cout_sub, 1), lambda n, m: (0, 0)),
            ],
            out_specs=pl.BlockSpec((1, Cout_sub, tile_m),
                                   lambda n, m: (n, 0, m)),
        ),
        compiler_params=pltpu.CompilerParams(
            dimension_semantics=("parallel", "parallel"),
            vmem_limit_bytes=vmem_limit),
    )(patches, w_t, b_p)

    # Un-pad; NCHW conversion is a plain reshape (no transpose copy).
    out = out[:, :Cout, :M].reshape(N, Cout, Ho, Wo)
    return out.astype(x_nchw.dtype)


def init_conv_params(key, in_features, out_features, kernel_size):
    """Deterministic PyTorch-style (kaiming-uniform-ish) init."""
    kw, kb = jax.random.split(key)
    fan_in = in_features * kernel_size * kernel_size
    bound = 1.0 / jnp.sqrt(fan_in)
    weight = jax.random.uniform(
        kw, (out_features, in_features, kernel_size, kernel_size),
        minval=-bound, maxval=bound, dtype=jnp.float32)
    bias = jax.random.uniform(
        kb, (out_features,), minval=-bound, maxval=bound, dtype=jnp.float32)
    return weight, bias


if __name__ == "__main__":
    key = jax.random.PRNGKey(0)
    k_x, k_p = jax.random.split(key)

    # Shapes consistent with convLayer(inFeatures=4, outFeatures=8, kernelSize=3)
    N, Cin, H, W = 2, 4, 16, 16
    Cout, Ksz = 8, 3

    x = jax.random.normal(k_x, (N, Cin, H, W), dtype=jnp.float32)
    weight, bias = init_conv_params(k_p, Cin, Cout, Ksz)

    fwd = jax.jit(conv_layer_forward)
    out = jax.block_until_ready(fwd(x, weight, bias))

    # Reference with the same bf16 rounding of x/w (f32 accumulation), matching
    # nn.Conv2d(stride=1, padding=0) semantics.
    # TODO(synk): for strict f32 parity with PyTorch, keep kernel operands f32
    # (lower MXU throughput); bf16-in / f32-accumulate is used here.
    x_r = x.astype(jnp.bfloat16).astype(jnp.float32)
    w_r = weight.astype(jnp.bfloat16).astype(jnp.float32)
    ref = jax.lax.conv_general_dilated(
        x_r, w_r, window_strides=(1, 1), padding="VALID",
        dimension_numbers=("NCHW", "OIHW", "NCHW")) + bias.reshape(1, Cout, 1, 1)

    assert out.shape == (N, Cout, H - Ksz + 1, W - Ksz + 1)
    max_err = float(jnp.max(jnp.abs(out - ref)))
    assert jnp.allclose(out, ref, atol=2e-2, rtol=2e-2), max_err

    print("KERNEL_OK")
</pallas_src>

<mosaic_0001>
module attributes {stable_mosaic.version = 11 : i64} {
  func.func @_conv_matmul_kernel(%arg0: i32, %arg1: i32, %arg2: memref<1x36x256xbf16, #tpu.memory_space<vmem>>, %arg3: memref<8x36xbf16, #tpu.memory_space<vmem>>, %arg4: memref<8x1xf32, #tpu.memory_space<vmem>>, %arg5: memref<1x8x256xf32, #tpu.memory_space<vmem>>) attributes {dimension_semantics = [#tpu.dimension_semantics<parallel>, #tpu.dimension_semantics<parallel>], iteration_bounds = array<i64: 2, 1>, scalar_prefetch = 0 : i64, scratch_operands = 0 : i64, tpu.core_type = #tpu.core_type<tc>, window_params = [{transform_indices = @transform_0, window_bounds = array<i64: 1, 36, 256>}, {pipeline_mode = #tpu.pipeline_mode<synchronous>, transform_indices = @transform_1, window_bounds = array<i64: 8, 36>}, {pipeline_mode = #tpu.pipeline_mode<synchronous>, transform_indices = @transform_2, window_bounds = array<i64: 8, 1>}, {transform_indices = @transform_3, window_bounds = array<i64: 1, 8, 256>}]} {
    %c0 = arith.constant 0 : index
    %c0_0 = arith.constant 0 : index
    %0 = vector.load %arg3[%c0, %c0_0] : memref<8x36xbf16, #tpu.memory_space<vmem>>, vector<8x36xbf16>
    %c0_1 = arith.constant 0 : index
    %c0_2 = arith.constant 0 : index
    %c0_3 = arith.constant 0 : index
    %1 = vector.load %arg2[%c0_1, %c0_2, %c0_3] : memref<1x36x256xbf16, #tpu.memory_space<vmem>>, vector<1x36x256xbf16>
    %2 = vector.shape_cast %1 : vector<1x36x256xbf16> to vector<36x256xbf16>
    %cst = arith.constant dense<0.000000e+00> : vector<8x256xf32>
    %3 = tpu.matmul %0, %2, %cst {dimension_numbers = #tpu.dot_dimension_numbers<[1], [0], [0], [1], [0, 0, 1, 1], [], []>} : vector<8x36xbf16>, vector<36x256xbf16>, vector<8x256xf32> -> vector<8x256xf32>
    %c0_4 = arith.constant 0 : index
    %c0_5 = arith.constant 0 : index
    %4 = vector.load %arg4[%c0_4, %c0_5] : memref<8x1xf32, #tpu.memory_space<vmem>>, vector<8x1xf32>
    %5 = vector.broadcast %4 : vector<8x1xf32> to vector<8x256xf32>
    %6 = arith.addf %3, %5 : vector<8x256xf32>
    %c0_6 = arith.constant 0 : index
    %c0_7 = arith.constant 0 : index
    %c0_8 = arith.constant 0 : index
    %7 = vector.load %arg5[%c0_6, %c0_7, %c0_8] : memref<1x8x256xf32, #tpu.memory_space<vmem>>, vector<1x8x256xf32>
    %8 = vector.shape_cast %7 : vector<1x8x256xf32> to vector<8x256xf32>
    %9 = vector.shape_cast %6 : vector<8x256xf32> to vector<1x8x256xf32>
    tpu.vector_store %arg5[%c0_6, %c0_7, %c0_8], %9 {strides = array<i32>} : memref<1x8x256xf32, #tpu.memory_space<vmem>>, vector<1x8x256xf32>,
    return
  }
  func.func @transform_0(%arg0: i32, %arg1: i32) -> (i32, i32, i32) {
    %c0_i32 = arith.constant 0 : i32
    %c0_i32_0 = arith.constant 0 : i32
    return %arg0, %c0_i32, %arg1 : i32, i32, i32
  }
  func.func @transform_1(%arg0: i32, %arg1: i32) -> (i32, i32) {
    %c0_i32 = arith.constant 0 : i32
    %c0_i32_0 = arith.constant 0 : i32
    %c0_i32_1 = arith.constant 0 : i32
    return %c0_i32, %c0_i32_0 : i32, i32
  }
  func.func @transform_2(%arg0: i32, %arg1: i32) -> (i32, i32) {
    %c0_i32 = arith.constant 0 : i32
    %c0_i32_0 = arith.constant 0 : i32
    %c0_i32_1 = arith.constant 0 : i32
    return %c0_i32, %c0_i32_0 : i32, i32
  }
  func.func @transform_3(%arg0: i32, %arg1: i32) -> (i32, i32, i32) {
    %c0_i32 = arith.constant 0 : i32
    %c0_i32_0 = arith.constant 0 : i32
    return %arg0, %c0_i32, %arg1 : i32, i32, i32
  }
}

</mosaic_0001>

<bundles_post_ra>
// kernel: conv_layer_forward.1
= control target key start
LH: loop header
LB: loop body
LE: loop exit
PB: predicated region body
PF: predicated region fallthrough
CT: control target
= control target key end

     0   :  { %s488_s12 = smov 0   ;;  %s490_s13 = smov 0   ;;  %s527_s0 = inlined_call_operand.vmem [shape: bf16[2,36,256], index: 0, kind: input, shape index: {}]   ;;  %s528_s1 = inlined_call_operand.vmem [shape: bf16[8,36], index: 1, kind: input, shape index: {}]   ;;  %s529_s2 = inlined_call_operand.vmem [shape: f32[8,1], index: 2, kind: input, shape index: {}]   ;;  %s530_s3 = inlined_call_operand.vmem [shape: f32[2,8,256], index: 3, kind: output, shape index: {}]  }
   0x1   :  { %s492_s14 = smov 0  }
   0x2 LB: > { %s25_s15 = sadd.s32 1, %s461_s13  ;;  %p393_p0 = scmp.ge.s32.totalorder %s465_s14, 1  ;;  %s465_s14 = sphi %s492_s14, %s13_s14   ;;  %s461_s13 = sphi %s490_s13, %s532_s13   ;;  %s457_s12 = sphi %s488_s12, %s531_s12  }
   0x3   : > { %p27_p1 = scmp.ge.s32.totalorder %s25_s15, 2  ;;  %p158_p2 = scmp.lt.s32.totalorder %s465_s14, 3 }
   0x5   : > { %s534_s15 = smov (%p27_p1, %s25_s15), 0  ;;  %p159_p3 = pnand %p393_p0, %p158_p2 }
   0x6   : > { %p191_p4 = scmp.lt.s32.totalorder (!%p159_p3), %s457_s12, 1  ;;  %v467_v0 = vmov (!%p159_p3), 0   ;;  %v217_v1 = vld [vmem:[%s529_s2] sm:$0xff] (!%p159_p3)  ;;  %vm252_vm0 = vcmask (!%p159_p3), 1041408   ;;  %vm248_vm1 = vcmask (!%p159_p3), 293888  }
   0x7   : > { %162 = sbr.rel (%p159_p3) target bundleno = 247 (0xf7), region = 32  ;;  %291 = vmatprep.mubr.bf16.mxu0 (!%p159_p3), %v467_v0  ;;  %434 = vset.pattern.permute.xlu0 (!%p159_p3), %v467_v0  ;;  %v211_v10 = vld [vmem:[%s528_s1] sm:$0xf] (!%p159_p3) }
   0x8   : > { %220 = vperm.xlu0 (!%p159_p3), %434, %v217_v1  }
   0xe   : > { %s536_s12 = smov (!%p191_p4, %s457_s12), 1 }
   0xf   : > { %s408_s18 = smul.u32 40, %s536_s12  ;;  %s407_s24 = sshll.u32 %s536_s12, 4 }
  0x10   : > { %s208_s27 = scalar_lea.vmem %s530_s3, %s407_s24 }
  0x11   : > { %s198_s21 = scalar_lea.vmem %s527_s0, %s408_s18 }
  0x12   : > { %v435_v2 = vld [vmem:[%s198_s21 + $0x4] ss:$8 sps:$4 sm:$0xff]   ;;  %v437_v3 = vld [vmem:[%s198_s21] ss:$8 sps:$4 sm:$0xff]   ;;  %v438_v4 = vld [vmem:[%s198_s21 + $0x14] ss:$8 sps:$4 sm:$0xff]  }
  0x13   : > { %259 = vmatprep.subr.bf16.mxu0 %v435_v2  ;;  %v216_v5 = vld [vmem:[%s198_s21 + $0x20] sm:$0x33]  ;;  %v440_v6 = vld [vmem:[%s198_s21 + $0x10] ss:$8 sps:$4 sm:$0xff]  }
  0x14   : > { %260 = vmatpush1.bf16.msra.mxu0 %v437_v3  ;;  %v402_v7 = vcombine.high %v216_v5, %v216_v5  ;;  %v401_v8 = vcombine.low %v216_v5, %v216_v5 }
  0x15   : > { %261 = vmatprep.subr.bf16.mxu0 %v438_v4 }
  0x16   : > { %v254_v9 = vsel %vm252_vm0, %v401_v8, 0 }
  0x18   : > { %262 = vmatpush1.bf16.msra.mxu0 %v440_v6 }
  0x19   : > { %403 = vmatprep.subr.msk.bf16.mxu0 %vm252_vm0, %v402_v7 }
  0x1c   : > { %264 = vmatpush1.bf16.msra.mxu0 %v254_v9 }
  0x1f   : > { %404 = vmatmul.mubr.msk.bf16.vlgmr.msra.gmra.mrb[0].mxu0 %vm248_vm1, %v211_v10 }
  0x87   : > { %v221_v11 = vpop.permute.xlu0 %220 }
  0xf2   : > { %v293_v12 = vpop.f32.mrb[0].mxu0 }
  0xf3   : > { %v294_v13 = vadd.f32 %v293_v12, %v221_v11  ;;  %v295_v14 = vpop.f32.mrb[1].mxu0 }
  0xf4   : > { %v296_v15 = vadd.f32 %v295_v14, %v221_v11  ;;  %v297_v16 = vpop.f32.mrb[2].mxu0 }
  0xf5   : > { %300 = vst [vmem:[%s208_s27] sm:$0xff] %v294_v13  ;;  %v298_v17 = vpop.f32.mrb[3].mxu0 }
  0xf6   : > { %301 = vst [vmem:[%s208_s27 + $0x8] sm:$0xff] %v296_v15 }
  0xf7 PF: > { %s13_s14 = sadd.s32 1, %s465_s14   ;;  %s531_s12 = smov %s461_s13 }
  0xf8   : > { %p10_p5 = scmp.ge.s32.totalorder %s13_s14, 4   ;;  %s532_s13 = smov %s534_s15 }
  0xfa   :  { %12 = sbr.rel (!%p10_p5) target bundleno = 2 (0x2), region = 62 }

</bundles_post_ra>
